<compile_context>
chip_gen: v7x
topology: tpu7x:2x2x1
jax: 0.10.0
libtpu: 0.0.40
codegen_flags: <defaults>
</compile_context>

<pallas_src>
import functools
import math

import jax
import jax.numpy as jnp
from jax.experimental import pallas as pl
from jax.experimental.pallas import tpu as pltpu


# ----------------------------------------------------------------------------
# In-kernel helpers (pure value math, traced inside the Pallas kernels)
# ----------------------------------------------------------------------------
def _erf_f32(x):
    # Abramowitz & Stegun 7.1.26 rational approximation (max abs err ~1.5e-7,
    # i.e. at f32 rounding level).  PyTorch nn.GELU default is the exact-erf form.
    # TODO(synk): switch to jax.lax.erf once erf_p lowering is guaranteed in Mosaic.
    a1, a2, a3, a4, a5 = (0.254829592, -0.284496736, 1.421413741,
                          -1.453152027, 1.061405429)
    p = 0.3275911
    s = jnp.sign(x)
    z = jnp.abs(x)
    t = 1.0 / (1.0 + p * z)
    poly = ((((a5 * t + a4) * t + a3) * t + a2) * t + a1) * t
    return s * (1.0 - poly * jnp.exp(-z * z))


def _gelu_exact(x):
    return 0.5 * x * (1.0 + _erf_f32(x * (1.0 / math.sqrt(2.0))))


def _layernorm(x, g, b, eps):
    # torchvision ViT uses LayerNorm(eps=1e-6); statistics kept in f32.
    mu = jnp.mean(x, axis=-1, keepdims=True)
    var = jnp.mean(jnp.square(x - mu), axis=-1, keepdims=True)
    return (x - mu) * jax.lax.rsqrt(var + eps) * g + b


# ----------------------------------------------------------------------------
# Pallas kernels
# ----------------------------------------------------------------------------
def _patch_embed_kernel(p_ref, w_ref, b_ref, cls_ref, pos_ref, o_ref, *, B, N):
    # p_ref: (B*N, C*P*P)  w_ref: (C*P*P, D)  b/cls: (1, D)  pos: (S, D)
    emb = jnp.dot(p_ref[...], w_ref[...], preferred_element_type=jnp.float32)
    emb = emb + b_ref[...]                              # (B*N, D)
    pos = pos_ref[...]
    cls_row = cls_ref[...] + pos[0:1, :]                # class token + pos[0]
    pos_patch = pos[1:, :]                              # (N, D)
    rows = []
    for b in range(B):                                  # static, tiny B
        rows.append(cls_row)
        rows.append(emb[b * N:(b + 1) * N, :] + pos_patch)
    o_ref[...] = jnp.concatenate(rows, axis=0).astype(o_ref.dtype)   # (B*S, D)


def _encoder_block_kernel(x_ref, ln1g_ref, ln1b_ref, wqkv_ref, bqkv_ref,
                          wo_ref, bo_ref, ln2g_ref, ln2b_ref,
                          w1_ref, b1_ref, w2_ref, b2_ref, o_ref,
                          *, B, S, D, H, hd, scale, eps):
    x = x_ref[...]                                      # (B*S, D) f32

    # ---- attention branch: LN1 fused into the packed QKV matmul ----
    xn = _layernorm(x, ln1g_ref[...], ln1b_ref[...], eps)
    qkv = jnp.dot(xn, wqkv_ref[...], preferred_element_type=jnp.float32)
    qkv = qkv + bqkv_ref[...]                           # (B*S, 3D), packed [q|k|v]

    # multi-head attention entirely in VMEM: slice heads off the lane axis,
    # static loops over (batch, head) -- no XLA transposes, no per-head grid steps.
    ctx_rows = []
    for b in range(B):
        r0 = b * S
        head_ctx = []
        for h in range(H):
            c = h * hd
            q = qkv[r0:r0 + S, c:c + hd]
            k = qkv[r0:r0 + S, D + c:D + c + hd]
            v = qkv[r0:r0 + S, 2 * D + c:2 * D + c + hd]
            s = jax.lax.dot_general(q, k, (((1,), (1,)), ((), ())),
                                    preferred_element_type=jnp.float32) * scale
            m = jnp.max(s, axis=-1, keepdims=True)
            p = jnp.exp(s - m)
            p = p * pl.reciprocal(jnp.sum(p, axis=-1, keepdims=True), approx=True)
            head_ctx.append(jnp.dot(p, v, preferred_element_type=jnp.float32))
        ctx_rows.append(jnp.concatenate(head_ctx, axis=-1))   # (S, D), heads on lanes
    ctx = jnp.concatenate(ctx_rows, axis=0)                   # (B*S, D)

    # out-projection + residual
    x = x + jnp.dot(ctx, wo_ref[...], preferred_element_type=jnp.float32) + bo_ref[...]

    # ---- MLP branch: LN2 fused into the first matmul ----
    xn2 = _layernorm(x, ln2g_ref[...], ln2b_ref[...], eps)
    h1 = jnp.dot(xn2, w1_ref[...], preferred_element_type=jnp.float32) + b1_ref[...]
    h1 = _gelu_exact(h1)
    x = x + jnp.dot(h1, w2_ref[...], preferred_element_type=jnp.float32) + b2_ref[...]

    o_ref[...] = x.astype(o_ref.dtype)


def _final_head_kernel(x_ref, g_ref, b_ref, w_ref, hb_ref, o_ref, *, eps):
    # x_ref: class tokens only, (B, D).  Final LN fused with the head matmul.
    xn = _layernorm(x_ref[...], g_ref[...], b_ref[...], eps)
    y = jnp.dot(xn, w_ref[...], preferred_element_type=jnp.float32) + hb_ref[...]
    o_ref[...] = y.astype(o_ref.dtype)


# ----------------------------------------------------------------------------
# pallas_call wrappers (full-array blocks; everything here is tiny and VMEM-resident)
# ----------------------------------------------------------------------------
def _full_spec(shape):
    return pl.BlockSpec(shape, lambda i, _n=len(shape): (0,) * _n)


def patch_embed(patches, w, b, cls_tok, pos, *, B, N, S, D):
    args = (patches, w, b, cls_tok, pos)
    return pl.pallas_call(
        functools.partial(_patch_embed_kernel, B=B, N=N),
        out_shape=jax.ShapeDtypeStruct((B * S, D), jnp.float32),
        grid=(1,),
        in_specs=[_full_spec(a.shape) for a in args],
        out_specs=_full_spec((B * S, D)),
        compiler_params=pltpu.CompilerParams(dimension_semantics=("arbitrary",)),
    )(*args)


def encoder_block(x, lp, *, B, S, D, H, hd, scale, eps=1e-6):
    args = (x, lp["ln1_g"], lp["ln1_b"], lp["qkv_w"], lp["qkv_b"],
            lp["out_w"], lp["out_b"], lp["ln2_g"], lp["ln2_b"],
            lp["mlp_w1"], lp["mlp_b1"], lp["mlp_w2"], lp["mlp_b2"])
    return pl.pallas_call(
        functools.partial(_encoder_block_kernel, B=B, S=S, D=D, H=H, hd=hd,
                          scale=scale, eps=eps),
        out_shape=jax.ShapeDtypeStruct((B * S, D), jnp.float32),
        grid=(1,),
        in_specs=[_full_spec(a.shape) for a in args],
        out_specs=_full_spec((B * S, D)),
        compiler_params=pltpu.CompilerParams(dimension_semantics=("arbitrary",)),
    )(*args)


def final_head(cls_tok, g, b, w, hb, *, eps=1e-6):
    Bc, _ = cls_tok.shape
    ncls = w.shape[1]
    args = (cls_tok, g, b, w, hb)
    return pl.pallas_call(
        functools.partial(_final_head_kernel, eps=eps),
        out_shape=jax.ShapeDtypeStruct((Bc, ncls), jnp.float32),
        grid=(1,),
        in_specs=[_full_spec(a.shape) for a in args],
        out_specs=_full_spec((Bc, ncls)),
        compiler_params=pltpu.CompilerParams(dimension_semantics=("arbitrary",)),
    )(*args)


# ----------------------------------------------------------------------------
# ViT forward (only patch extraction + class-token slice remain as XLA glue)
# ----------------------------------------------------------------------------
def vit_forward(x_img, params, cfg):
    B, C, Himg, Wimg = x_img.shape
    P, D, nheads = cfg["patch"], cfg["hidden"], cfg["heads"]
    nH, nW = Himg // P, Wimg // P
    N = nH * nW
    S = N + 1
    hd = D // nheads
    scale = 1.0 / math.sqrt(hd)

    # Conv2d(kernel=stride=P) patch embedding == matmul over flattened patches.
    patches = (x_img.reshape(B, C, nH, P, nW, P)
               .transpose(0, 2, 4, 1, 3, 5)
               .reshape(B * N, C * P * P))

    # patch-embed matmul + class token + positional embedding: one fused kernel.
    # (dropout after pos-embedding is identity in eval mode)
    x = patch_embed(patches, params["patch_w"], params["patch_b"],
                    params["cls_token"], params["pos_emb"], B=B, N=N, S=S, D=D)

    # One fused pallas_call per encoder block; weights already pre-transposed.
    # TODO(synk): at real ViT-B sizes (D=768, mlp=3072, 12 layers) tile these
    # full-array blocks over tokens/N with an explicit grid + vmem_limit_bytes,
    # cast activations/weights to bf16 (f32 accumulation), stack per-layer
    # weights and double-buffer-prefetch them across layers.
    for lp in params["layers"]:
        x = encoder_block(x, lp, B=B, S=S, D=D, H=nheads, hd=hd, scale=scale)

    # Class token sliced BEFORE the final LayerNorm (row-wise LN => identical
    # result), then final LN + classification head fused into one tiny kernel.
    cls_tok = x.reshape(B, S, D)[:, 0, :]                      # (B, D)
    return final_head(cls_tok, params["lnf_g"], params["lnf_b"],
                      params["head_w"], params["head_b"])      # (B, classes)


# ----------------------------------------------------------------------------
# Deterministic synthetic parameters, stored directly in kernel layout
# (i.e. PyTorch weights pre-transposed once at init -> no .T per forward pass).
# ----------------------------------------------------------------------------
def init_vit_params(key, cfg):
    C, P, D = cfg["channels"], cfg["patch"], cfg["hidden"]
    L, M, ncls, S = cfg["layers"], cfg["mlp"], cfg["classes"], cfg["seq"]
    keys = jax.random.split(key, 4 + L)

    def nrm(k, shape):
        return (0.02 * jax.random.normal(k, shape)).astype(jnp.float32)

    params = {
        # conv_proj weight (D, C, P, P) stored flattened + transposed: (C*P*P, D)
        "patch_w": nrm(keys[0], (C * P * P, D)),
        "patch_b": jnp.zeros((1, D), jnp.float32),
        "cls_token": nrm(keys[1], (1, D)),
        "pos_emb": nrm(keys[2], (S, D)),
        "lnf_g": jnp.ones((1, D), jnp.float32),
        "lnf_b": jnp.zeros((1, D), jnp.float32),
        # head weight (classes, D) stored pre-transposed: (D, classes)
        "head_w": nrm(keys[3], (D, ncls)),
        "head_b": jnp.zeros((1, ncls), jnp.float32),
        "layers": [],
    }
    for l in range(L):
        lk = jax.random.split(keys[4 + l], 4)
        params["layers"].append({
            "ln1_g": jnp.ones((1, D), jnp.float32),
            "ln1_b": jnp.zeros((1, D), jnp.float32),
            # in_proj_weight (3D, D) stored pre-transposed: (D, 3D), packed [q|k|v]
            "qkv_w": nrm(lk[0], (D, 3 * D)),
            "qkv_b": jnp.zeros((1, 3 * D), jnp.float32),
            # out_proj weight (D, D) stored pre-transposed
            "out_w": nrm(lk[1], (D, D)),
            "out_b": jnp.zeros((1, D), jnp.float32),
            "ln2_g": jnp.ones((1, D), jnp.float32),
            "ln2_b": jnp.zeros((1, D), jnp.float32),
            # mlp weights stored pre-transposed: (D, M) and (M, D)
            "mlp_w1": nrm(lk[2], (D, M)),
            "mlp_b1": jnp.zeros((1, M), jnp.float32),
            "mlp_w2": nrm(lk[3], (M, D)),
            "mlp_b2": jnp.zeros((1, D), jnp.float32),
        })
    return params


if __name__ == "__main__":
    cfg = {
        "channels": 3,
        "image": 32,
        "patch": 16,     # same patch size as ViT-B/16
        "hidden": 64,    # scaled down from 768
        "heads": 4,      # scaled down from 12
        "mlp": 128,      # scaled down from 3072
        "layers": 2,     # scaled down from 12
        "classes": 10,   # scaled down from 1000
    }
    cfg["seq"] = (cfg["image"] // cfg["patch"]) ** 2 + 1   # patches + class token

    key = jax.random.PRNGKey(0)
    k_x, k_p = jax.random.split(key)
    x = jax.random.normal(k_x, (2, cfg["channels"], cfg["image"], cfg["image"]),
                          dtype=jnp.float32)               # NCHW, like the PyTorch module
    params = init_vit_params(k_p, cfg)

    logits = jax.block_until_ready(vit_forward(x, params, cfg))
    assert logits.shape == (2, cfg["classes"])
    print("KERNEL_OK")
</pallas_src>

<mosaic_0001>
module attributes {stable_mosaic.version = 11 : i64} {
  func.func @_patch_embed_kernel(%arg0: i32, %arg1: memref<8x768xf32, #tpu.memory_space<vmem>>, %arg2: memref<768x64xf32, #tpu.memory_space<vmem>>, %arg3: memref<1x64xf32, #tpu.memory_space<vmem>>, %arg4: memref<1x64xf32, #tpu.memory_space<vmem>>, %arg5: memref<5x64xf32, #tpu.memory_space<vmem>>, %arg6: memref<10x64xf32, #tpu.memory_space<vmem>>) attributes {dimension_semantics = [#tpu.dimension_semantics<arbitrary>], iteration_bounds = array<i64: 1>, scalar_prefetch = 0 : i64, scratch_operands = 0 : i64, tpu.core_type = #tpu.core_type<tc>, window_params = [{pipeline_mode = #tpu.pipeline_mode<synchronous>, transform_indices = @transform_0, window_bounds = array<i64: 8, 768>}, {pipeline_mode = #tpu.pipeline_mode<synchronous>, transform_indices = @transform_1, window_bounds = array<i64: 768, 64>}, {pipeline_mode = #tpu.pipeline_mode<synchronous>, transform_indices = @transform_2, window_bounds = array<i64: 1, 64>}, {pipeline_mode = #tpu.pipeline_mode<synchronous>, transform_indices = @transform_3, window_bounds = array<i64: 1, 64>}, {pipeline_mode = #tpu.pipeline_mode<synchronous>, transform_indices = @transform_4, window_bounds = array<i64: 5, 64>}, {pipeline_mode = #tpu.pipeline_mode<synchronous>, transform_indices = @transform_5, window_bounds = array<i64: 10, 64>}]} {
    %c0 = arith.constant 0 : index
    %c0_0 = arith.constant 0 : index
    %0 = vector.load %arg1[%c0, %c0_0] : memref<8x768xf32, #tpu.memory_space<vmem>>, vector<8x768xf32>
    %c0_1 = arith.constant 0 : index
    %c0_2 = arith.constant 0 : index
    %1 = vector.load %arg2[%c0_1, %c0_2] : memref<768x64xf32, #tpu.memory_space<vmem>>, vector<768x64xf32>
    %cst = arith.constant dense<0.000000e+00> : vector<8x64xf32>
    %2 = tpu.matmul %0, %1, %cst {dimension_numbers = #tpu.dot_dimension_numbers<[1], [0], [0], [1], [0, 0, 1, 1], [], []>} : vector<8x768xf32>, vector<768x64xf32>, vector<8x64xf32> -> vector<8x64xf32>
    %c0_3 = arith.constant 0 : index
    %c0_4 = arith.constant 0 : index
    %3 = vector.load %arg3[%c0_3, %c0_4] : memref<1x64xf32, #tpu.memory_space<vmem>>, vector<1x64xf32>
    %4 = vector.broadcast %3 : vector<1x64xf32> to vector<8x64xf32>
    %5 = arith.addf %2, %4 : vector<8x64xf32>
    %c0_5 = arith.constant 0 : index
    %c0_6 = arith.constant 0 : index
    %6 = vector.load %arg5[%c0_5, %c0_6] : memref<5x64xf32, #tpu.memory_space<vmem>>, vector<5x64xf32>
    %c0_7 = arith.constant 0 : index
    %c0_8 = arith.constant 0 : index
    %7 = vector.load %arg4[%c0_7, %c0_8] : memref<1x64xf32, #tpu.memory_space<vmem>>, vector<1x64xf32>
    %8 = vector.extract_strided_slice %6 {offsets = [0, 0], sizes = [1, 64], strides = [1, 1]} : vector<5x64xf32> to vector<1x64xf32>
    %9 = arith.addf %7, %8 : vector<1x64xf32>
    %10 = vector.extract_strided_slice %6 {offsets = [1, 0], sizes = [4, 64], strides = [1, 1]} : vector<5x64xf32> to vector<4x64xf32>
    %11 = vector.extract_strided_slice %5 {offsets = [0, 0], sizes = [4, 64], strides = [1, 1]} : vector<8x64xf32> to vector<4x64xf32>
    %12 = arith.addf %11, %10 : vector<4x64xf32>
    %13 = vector.extract_strided_slice %5 {offsets = [4, 0], sizes = [4, 64], strides = [1, 1]} : vector<8x64xf32> to vector<4x64xf32>
    %14 = arith.addf %13, %10 : vector<4x64xf32>
    %15 = tpu.concatenate %9, %12, %9, %14 in 0 : vector<1x64xf32>, vector<4x64xf32>, vector<1x64xf32>, vector<4x64xf32> -> vector<10x64xf32>
    %c0_9 = arith.constant 0 : index
    %c0_10 = arith.constant 0 : index
    %16 = vector.load %arg6[%c0_9, %c0_10] : memref<10x64xf32, #tpu.memory_space<vmem>>, vector<10x64xf32>
    tpu.vector_store %arg6[%c0_9, %c0_10], %15 {strides = array<i32>} : memref<10x64xf32, #tpu.memory_space<vmem>>, vector<10x64xf32>,
    return
  }
  func.func @transform_0(%arg0: i32) -> (i32, i32) {
    %c0_i32 = arith.constant 0 : i32
    %c0_i32_0 = arith.constant 0 : i32
    %c0_i32_1 = arith.constant 0 : i32
    return %c0_i32, %c0_i32_0 : i32, i32
  }
  func.func @transform_1(%arg0: i32) -> (i32, i32) {
    %c0_i32 = arith.constant 0 : i32
    %c0_i32_0 = arith.constant 0 : i32
    %c0_i32_1 = arith.constant 0 : i32
    return %c0_i32, %c0_i32_0 : i32, i32
  }
  func.func @transform_2(%arg0: i32) -> (i32, i32) {
    %c0_i32 = arith.constant 0 : i32
    %c0_i32_0 = arith.constant 0 : i32
    %c0_i32_1 = arith.constant 0 : i32
    return %c0_i32, %c0_i32_0 : i32, i32
  }
  func.func @transform_3(%arg0: i32) -> (i32, i32) {
    %c0_i32 = arith.constant 0 : i32
    %c0_i32_0 = arith.constant 0 : i32
    %c0_i32_1 = arith.constant 0 : i32
    return %c0_i32, %c0_i32_0 : i32, i32
  }
  func.func @transform_4(%arg0: i32) -> (i32, i32) {
    %c0_i32 = arith.constant 0 : i32
    %c0_i32_0 = arith.constant 0 : i32
    %c0_i32_1 = arith.constant 0 : i32
    return %c0_i32, %c0_i32_0 : i32, i32
  }
  func.func @transform_5(%arg0: i32) -> (i32, i32) {
    %c0_i32 = arith.constant 0 : i32
    %c0_i32_0 = arith.constant 0 : i32
    %c0_i32_1 = arith.constant 0 : i32
    return %c0_i32, %c0_i32_0 : i32, i32
  }
}

</mosaic_0001>

<bundles_post_ra>
// kernel: tpu_custom_call.1
= control target key start
LH: loop header
LB: loop body
LE: loop exit
PB: predicated region body
PF: predicated region fallthrough
CT: control target
= control target key end

     0   :  { %s977_s0 = inlined_call_operand.vmem [shape: f32[8,768], index: 0, kind: input, shape index: {}]   ;;  %s978_s1 = inlined_call_operand.vmem [shape: f32[768,64], index: 1, kind: input, shape index: {}]   ;;  %s979_s2 = inlined_call_operand.vmem [shape: f32[1,64], index: 2, kind: input, shape index: {}]   ;;  %s980_s3 = inlined_call_operand.vmem [shape: f32[1,64], index: 3, kind: input, shape index: {}]   ;;  %s981_s4 = inlined_call_operand.vmem [shape: f32[5,64], index: 4, kind: input, shape index: {}]   ;;  %s982_s5 = inlined_call_operand.hbm [shape: f32[10,64], index: 5, kind: output, shape index: {}]  }
   0x1   :  { %v43_v0 = vld [vmem:[%s978_s1 + $0x80] sm:$0xff]  ;;  %v44_v1 = vld [vmem:[%s978_s1 + $0x88] sm:$0xff]  ;;  %v45_v11 = vld [vmem:[%s978_s1 + $0x90] sm:$0xff] }
   0x2   :  { %v27_v2 = vld [vmem:[%s978_s1] sm:$0xff]  ;;  %v494_v3 = vpack.c.bf16 %v44_v1, %v43_v0  ;;  %v28_v4 = vld [vmem:[%s978_s1 + $0x8] sm:$0xff]  ;;  %v46_v13 = vld [vmem:[%s978_s1 + $0x98] sm:$0xff] }
   0x3   :  { %v75_v5 = vld [vmem:[%s978_s1 + $0x180] sm:$0xff]  ;;  %v76_v6 = vld [vmem:[%s978_s1 + $0x188] sm:$0xff]  ;;  %v496_v7 = vpack.c.bf16 %v28_v4, %v27_v2  ;;  %v29_v14 = vld [vmem:[%s978_s1 + $0x10] sm:$0xff]  ;;  %v498_v16 = vpack.c.bf16 %v46_v13, %v45_v11 }
   0x4   :  { %v526_v8 = vpack.c.bf16 %v76_v6, %v75_v5  ;;  %v59_v9 = vld [vmem:[%s978_s1 + $0x100] sm:$0xff]  ;;  %v60_v10 = vld [vmem:[%s978_s1 + $0x108] sm:$0xff]  ;;  %495 = vmatprep.subr.bf16.mxu0 %v494_v3  ;;  %v30_v15 = vld [vmem:[%s978_s1 + $0x18] sm:$0xff] }
   0x5   :  { %v528_v12 = vpack.c.bf16 %v60_v10, %v59_v9  ;;  %497 = vmatpush3.bf16.msra.mxu0 %v496_v7  ;;  %v500_v17 = vpack.c.bf16 %v30_v15, %v29_v14  ;;  %v77_v18 = vld [vmem:[%s978_s1 + $0x190] sm:$0xff]  ;;  %v78_v19 = vld [vmem:[%s978_s1 + $0x198] sm:$0xff]  ;;  %v47_v23 = vld [vmem:[%s978_s1 + $0xa0] sm:$0xff] }
   0x6   :  { %527 = vmatprep.subr.bf16.mxu1 %v526_v8  ;;  %v61_v20 = vld [vmem:[%s978_s1 + $0x110] sm:$0xff]  ;;  %v530_v21 = vpack.c.bf16 %v78_v19, %v77_v18  ;;  %v62_v22 = vld [vmem:[%s978_s1 + $0x118] sm:$0xff]  ;;  %v48_v24 = vld [vmem:[%s978_s1 + $0xa8] sm:$0xff]  ;;  %499 = vmatprep.subr.bf16.mxu0 %v498_v16 }
   0x7   :  { %529 = vmatpush3.bf16.msra.mxu1 %v528_v12  ;;  %v532_v25 = vpack.c.bf16 %v62_v22, %v61_v20  ;;  %v502_v26 = vpack.c.bf16 %v48_v24, %v47_v23  ;;  %v31_v27 = vld [vmem:[%s978_s1 + $0x20] sm:$0xff]  ;;  %v32_v28 = vld [vmem:[%s978_s1 + $0x28] sm:$0xff]  ;;  %v49_v35 = vld [vmem:[%s978_s1 + $0xb0] sm:$0xff] }
   0x8   :  { %v79_v29 = vld [vmem:[%s978_s1 + $0x1a0] sm:$0xff]  ;;  %531 = vmatprep.subr.bf16.mxu1 %v530_v21  ;;  %v80_v30 = vld [vmem:[%s978_s1 + $0x1a8] sm:$0xff]  ;;  %v504_v33 = vpack.c.bf16 %v32_v28, %v31_v27  ;;  %v50_v36 = vld [vmem:[%s978_s1 + $0xb8] sm:$0xff] }
   0x9   :  { %v63_v31 = vld [vmem:[%s978_s1 + $0x120] sm:$0xff]  ;;  %v64_v32 = vld [vmem:[%s978_s1 + $0x128] sm:$0xff]  ;;  %501 = vmatpush3.bf16.msra.mxu0 %v500_v17  ;;  %v534_v34 = vpack.c.bf16 %v80_v30, %v79_v29  ;;  %v33_v37 = vld [vmem:[%s978_s1 + $0x30] sm:$0xff]  ;;  %v506_v39 = vpack.c.bf16 %v50_v36, %v49_v35 }
   0xa   :  { %503 = vmatprep.subr.bf16.mxu0 %v502_v26  ;;  %v536_v38 = vpack.c.bf16 %v64_v32, %v63_v31  ;;  %v34_v40 = vld [vmem:[%s978_s1 + $0x38] sm:$0xff]  ;;  %v81_v41 = vld [vmem:[%s978_s1 + $0x1b0] sm:$0xff]  ;;  %v51_v46 = vld [vmem:[%s978_s1 + $0xc0] sm:$0xff] }
   0xb   :  { %533 = vmatpush3.bf16.msra.mxu1 %v532_v25  ;;  %v82_v42 = vld [vmem:[%s978_s1 + $0x1b8] sm:$0xff]  ;;  %v65_v44 = vld [vmem:[%s978_s1 + $0x130] sm:$0xff]  ;;  %v52_v47 = vld [vmem:[%s978_s1 + $0xc8] sm:$0xff]  ;;  %v508_v48 = vpack.c.bf16 %v34_v40, %v33_v37 }
   0xc   :  { %535 = vmatprep.subr.bf16.mxu1 %v534_v34  ;;  %v538_v43 = vpack.c.bf16 %v82_v42, %v81_v41  ;;  %v66_v45 = vld [vmem:[%s978_s1 + $0x138] sm:$0xff]  ;;  %v83_v49 = vld [vmem:[%s978_s1 + $0x1c0] sm:$0xff]  ;;  %v84_v50 = vld [vmem:[%s978_s1 + $0x1c8] sm:$0xff]  ;;  %v510_v52 = vpack.c.bf16 %v52_v47, %v51_v46 }
   0xd   :  { %505 = vmatpush3.bf16.msra.mxu0 %v504_v33  ;;  %v540_v51 = vpack.c.bf16 %v66_v45, %v65_v44  ;;  %v35_v53 = vld [vmem:[%s978_s1 + $0x40] sm:$0xff]  ;;  %v36_v54 = vld [vmem:[%s978_s1 + $0x48] sm:$0xff]  ;;  %v542_v56 = vpack.c.bf16 %v84_v50, %v83_v49  ;;  %v53_v58 = vld [vmem:[%s978_s1 + $0xd0] sm:$0xff] }
   0xe   :  { %507 = vmatprep.subr.bf16.mxu0 %v506_v39  ;;  %v67_v55 = vld [vmem:[%s978_s1 + $0x140] sm:$0xff]  ;;  %v68_v57 = vld [vmem:[%s978_s1 + $0x148] sm:$0xff]  ;;  %v54_v59 = vld [vmem:[%s978_s1 + $0xd8] sm:$0xff]  ;;  %v512_v62 = vpack.c.bf16 %v36_v54, %v35_v53 }
   0xf   :  { %537 = vmatpush3.bf16.msra.mxu1 %v536_v38  ;;  %v85_v60 = vld [vmem:[%s978_s1 + $0x1d0] sm:$0xff]  ;;  %v86_v61 = vld [vmem:[%s978_s1 + $0x1d8] sm:$0xff]  ;;  %v544_v63 = vpack.c.bf16 %v68_v57, %v67_v55  ;;  %v514_v0 = vpack.c.bf16 %v54_v59, %v53_v58  ;;  %v55_v6 = vld [vmem:[%s978_s1 + $0xe0] sm:$0xff] }
  0x10   :  { %539 = vmatprep.subr.bf16.mxu1 %v538_v43  ;;  %v37_v1 = vld [vmem:[%s978_s1 + $0x50] sm:$0xff]  ;;  %v38_v2 = vld [vmem:[%s978_s1 + $0x58] sm:$0xff]  ;;  %v546_v4 = vpack.c.bf16 %v86_v61, %v85_v60  ;;  %v56_v7 = vld [vmem:[%s978_s1 + $0xe8] sm:$0xff] }
  0x11   :  { %509 = vmatpush3.bf16.msra.mxu0 %v508_v48  ;;  %v69_v3 = vld [vmem:[%s978_s1 + $0x150] sm:$0xff]  ;;  %v70_v5 = vld [vmem:[%s978_s1 + $0x158] sm:$0xff]  ;;  %v87_v8 = vld [vmem:[%s978_s1 + $0x1e0] sm:$0xff]  ;;  %v516_v10 = vpack.c.bf16 %v38_v2, %v37_v1  ;;  %v518_v14 = vpack.c.bf16 %v56_v7, %v55_v6 }
  0x12   :  { %511 = vmatprep.subr.bf16.mxu0 %v510_v52  ;;  %v88_v9 = vld [vmem:[%s978_s1 + $0x1e8] sm:$0xff]  ;;  %v39_v11 = vld [vmem:[%s978_s1 + $0x60] sm:$0xff]  ;;  %v548_v13 = vpack.c.bf16 %v70_v5, %v69_v3  ;;  %v57_v19 = vld [vmem:[%s978_s1 + $0xf0] sm:$0xff] }
  0x13   :  { %541 = vmatpush3.bf16.msra.mxu1 %v540_v51  ;;  %v22_v12 = vld [vmem:[%s977_s0 + $0x8] sm:$0xff]  ;;  %v71_v16 = vld [vmem:[%s978_s1 + $0x160] sm:$0xff]  ;;  %v550_v18 = vpack.c.bf16 %v88_v9, %v87_v8  ;;  %v58_v20 = vld [vmem:[%s978_s1 + $0xf8] sm:$0xff] }
  0x14   :  { %543 = vmatprep.subr.bf16.mxu1 %v542_v56  ;;  %v40_v15 = vld [vmem:[%s978_s1 + $0x68] sm:$0xff]  ;;  %194 = vmatprep.mubr.f32.mxu0 %v22_v12  ;;  %v24_v21 = vld [vmem:[%s977_s0 + $0x18] sm:$0xff]  ;;  %v89_v22 = vld [vmem:[%s978_s1 + $0x1f0] sm:$0xff]  ;;  %v522_v26 = vpack.c.bf16 %v58_v20, %v57_v19 }
  0x15   :  { %513 = vmatpush3.bf16.msra.mxu0 %v512_v62  ;;  %v72_v17 = vld [vmem:[%s978_s1 + $0x168] sm:$0xff]  ;;  %v90_v23 = vld [vmem:[%s978_s1 + $0x1f8] sm:$0xff]  ;;  %264 = vmatprep.mubr.f32.mxu1 %v24_v21  ;;  %v520_v24 = vpack.c.bf16 %v40_v15, %v39_v11  ;;  %v41_v27 = vld [vmem:[%s978_s1 + $0x70] sm:$0xff] }
  0x16   :  { %515 = vmatprep.subr.bf16.mxu0 %v514_v0  ;;  %v552_v25 = vpack.c.bf16 %v72_v17, %v71_v16  ;;  %v42_v28 = vld [vmem:[%s978_s1 + $0x78] sm:$0xff]  ;;  %v73_v29 = vld [vmem:[%s978_s1 + $0x170] sm:$0xff]  ;;  %v554_v30 = vpack.c.bf16 %v90_v23, %v89_v22  ;;  %v107_v32 = vld [vmem:[%s978_s1 + $0x280] sm:$0xff] }
  0x17   :  { %545 = vmatpush3.bf16.msra.mxu1 %v544_v63  ;;  %v74_v31 = vld [vmem:[%s978_s1 + $0x178] sm:$0xff]  ;;  %v108_v33 = vld [vmem:[%s978_s1 + $0x288] sm:$0xff]  ;;  %v524_v34 = vpack.c.bf16 %v42_v28, %v41_v27  ;;  %v91_v37 = vld [vmem:[%s978_s1 + $0x200] sm:$0xff] }
  0x18   :  { %547 = vmatprep.subr.bf16.mxu1 %v546_v4  ;;  %v556_v35 = vpack.c.bf16 %v74_v31, %v73_v29  ;;  %v558_v36 = vpack.c.bf16 %v108_v33, %v107_v32  ;;  %v92_v38 = vld [vmem:[%s978_s1 + $0x208] sm:$0xff]  ;;  %v109_v39 = vld [vmem:[%s978_s1 + $0x290] sm:$0xff]  ;;  %v110_v40 = vld [vmem:[%s978_s1 + $0x298] sm:$0xff] }
  0x19   :  { %517 = vmatpush3.bf16.msra.mxu0 %v516_v10  ;;  %v21_v41 = vld [vmem:[%s977_s0] sm:$0xff]  ;;  %v560_v42 = vpack.c.bf16 %v92_v38, %v91_v37  ;;  %v23_v43 = vld [vmem:[%s977_s0 + $0x10] sm:$0xff]  ;;  %v562_v44 = vpack.c.bf16 %v110_v40, %v109_v39  ;;  %v94_v46 = vld [vmem:[%s978_s1 + $0x218] sm:$0xff] }
  0x1a   :  { %519 = vmatprep.subr.bf16.mxu0 %v518_v14  ;;  %v93_v45 = vld [vmem:[%s978_s1 + $0x210] sm:$0xff]  ;;  %v111_v47 = vld [vmem:[%s978_s1 + $0x2a0] sm:$0xff]  ;;  %v112_v48 = vld [vmem:[%s978_s1 + $0x2a8] sm:$0xff] }
  0x1b   :  { %549 = vmatpush3.bf16.msra.mxu1 %v548_v13  ;;  %v26_v49 = vld [vmem:[%s977_s0 + $0x28] sm:$0xff] }
  0x1c   :  { %551 = vmatprep.subr.bf16.mxu1 %v550_v18 }
  0x1d   :  { %521 = vmatpush3.bf16.msra.mxu0 %v520_v24 }
  0x1e   :  { %523 = vmatprep.subr.bf16.mxu0 %v522_v26 }
  0x1f   :  { %553 = vmatpush3.bf16.msra.mxu1 %v552_v25 }
  0x20   :  { %555 = vmatprep.subr.bf16.mxu1 %v554_v30 }
  0x21   :  { %525 = vmatpush3.bf16.msra.mxu0 %v524_v34 }
  0x22   :  { %559 = vmatprep.subr.bf16.mxu0 %v558_v36 }
  0x23   :  { %557 = vmatpush3.bf16.msra.mxu1 %v556_v35 }
  0x24   :  { %10 = vsyncpa [#allocation3], 0  ;;  %195 = vmatmul.mubr.f32.vlgmr.msra.gmra.mrb[0].mxu0 %v21_v41  ;;  %v564_v50 = vpack.c.bf16 %v94_v46, %v93_v45  ;;  %v566_v51 = vpack.c.bf16 %v112_v48, %v111_v47  ;;  %v95_v52 = vld [vmem:[%s978_s1 + $0x220] sm:$0xff]  ;;  %v96_v53 = vld [vmem:[%s978_s1 + $0x228] sm:$0xff]  ;;  %v354_v31 = vlaneseq  ;;  %vm362_vm0 = vcmask 1040384  }
  0x25   :  { %561 = vmatpush3.bf16.msra.mxu0 %v560_v42  ;;  %334 = vmatprep.mubr.f32.mxu0 %v26_v49  ;;  %v113_v54 = vld [vmem:[%s978_s1 + $0x2b0] sm:$0xff]  ;;  %v114_v55 = vld [vmem:[%s978_s1 + $0x2b8] sm:$0xff]  ;;  %v568_v56 = vpack.c.bf16 %v96_v53, %v95_v52  ;;  %v115_v60 = vld [vmem:[%s978_s1 + $0x2c0] sm:$0xff]  ;;  %vm370_vm1 = vcmask 517120   ;;  %vm364_vm2 = vcmask 1044480   ;;  %vm366_vm3 = vcmask 1045504  }
  0x26   :  { %265 = vmatmul.mubr.f32.vlgmr.msra.gmra.mrb[0].mxu1 %v23_v43  ;;  %563 = vmatprep.subr.bf16.mxu0 %v562_v44  ;;  %v570_v57 = vpack.c.bf16 %v114_v55, %v113_v54  ;;  %v97_v58 = vld [vmem:[%s978_s1 + $0x230] sm:$0xff]  ;;  %v98_v59 = vld [vmem:[%s978_s1 + $0x238] sm:$0xff]  ;;  %v116_v61 = vld [vmem:[%s978_s1 + $0x2c8] sm:$0xff]  ;;  %v355_v33 = vshrl.u32 %v354_v31, 7  ;;  %vm368_vm4 = vcmask 523264  }
  0x27   :  { %v572_v62 = vpack.c.bf16 %v98_v59, %v97_v58  ;;  %v574_v63 = vpack.c.bf16 %v116_v61, %v115_v60  ;;  %v99_v0 = vld [vmem:[%s978_s1 + $0x240] sm:$0xff]  ;;  %v100_v1 = vld [vmem:[%s978_s1 + $0x248] sm:$0xff]  ;;  %v117_v2 = vld [vmem:[%s978_s1 + $0x2d0] sm:$0xff] }
  0x28   :  { %v118_v3 = vld [vmem:[%s978_s1 + $0x2d8] sm:$0xff]  ;;  %v576_v4 = vpack.c.bf16 %v100_v1, %v99_v0  ;;  %v101_v6 = vld [vmem:[%s978_s1 + $0x250] sm:$0xff]  ;;  %v119_v8 = vld [vmem:[%s978_s1 + $0x2e0] sm:$0xff]  ;;  %v356_v41 = vsub.s32 0, %v355_v33 }
  0x29   :  { %565 = vmatpush3.bf16.msra.mxu0 %v564_v50  ;;  %v578_v5 = vpack.c.bf16 %v118_v3, %v117_v2  ;;  %v102_v7 = vld [vmem:[%s978_s1 + $0x258] sm:$0xff]  ;;  %v120_v9 = vld [vmem:[%s978_s1 + $0x2e8] sm:$0xff]  ;;  %v103_v12 = vld [vmem:[%s978_s1 + $0x260] sm:$0xff] }
  0x2a   :  { %567 = vmatprep.subr.bf16.mxu0 %v566_v51  ;;  %v580_v10 = vpack.c.bf16 %v102_v7, %v101_v6  ;;  %v582_v11 = vpack.c.bf16 %v120_v9, %v119_v8  ;;  %v104_v13 = vld [vmem:[%s978_s1 + $0x268] sm:$0xff]  ;;  %v121_v14 = vld [vmem:[%s978_s1 + $0x2f0] sm:$0xff]  ;;  %v122_v15 = vld [vmem:[%s978_s1 + $0x2f8] sm:$0xff] }
  0x2b   :  { %v584_v16 = vpack.c.bf16 %v104_v13, %v103_v12  ;;  %v586_v17 = vpack.c.bf16 %v122_v15, %v121_v14  ;;  %v105_v18 = vld [vmem:[%s978_s1 + $0x270] sm:$0xff]  ;;  %v106_v19 = vld [vmem:[%s978_s1 + $0x278] sm:$0xff]  ;;  %v25_v21 = vld [vmem:[%s977_s0 + $0x20] sm:$0xff] }
  0x2c   :  { %v588_v20 = vpack.c.bf16 %v106_v19, %v105_v18  ;;  %v388_v23 = vld [vmem:[%s979_s2] ss:$0 sm:$0xff]  ;;  %s617_s2 = smov [#allocation2]  }
  0x2d   :  { %569 = vmatpush3.bf16.msra.mxu0 %v568_v56  ;;  %v340_v32 = vld [vmem:[%s981_s4] sm:$0x1f]  ;;  %s377_s4 = sshll.u32 %s617_s2, 4  ;;  %s378_s4 = int_to_ptr.vmem [resolvable:$true] %s377_s4 }
  0x2e   :  { %571 = vmatprep.subr.bf16.mxu0 %v570_v57  ;;  %v341_v35 = vld [vmem:[%s980_s3] sm:$0x1]  ;;  %v344_v38 = vrot.slane %v340_v32, 1  ;;  %v347_v39 = vrot.slane %v340_v32, 5  ;;  %s593_s3 = scalar_lea.vmem %s378_s4, 256  ;;  %p598_p1 = scmp.lt.s32.totalorder %s378_s4, %s378_s4 }
  0x2f   :  { %v342_v40 = vadd.f32 %v341_v35, %v340_v32  ;;  %p594_p0 = scmp.ne.s32.totalorder %s378_s4, %s593_s3  ;;  %p599_p2 = scmp.lt.s32.totalorder %s593_s3, %s593_s3 }
  0x31   :  { %573 = vmatpush3.bf16.msra.mxu0 %v572_v62  ;;  %v357_v45 = vrot.slane %v342_v40, %v356_v41  ;;  %p600_p3 = por %p599_p2, %p598_p1 }
  0x32   :  { %575 = vmatprep.subr.bf16.mxu0 %v574_v63 }
  0x33   :  { %p601_p4 = pnand %p600_p3, %p594_p0 }
  0x35   :  { %577 = vmatpush3.bf16.msra.mxu0 %v576_v4 }
  0x36   :  { %579 = vmatprep.subr.bf16.mxu0 %v578_v5 }
  0x39   :  { %581 = vmatpush3.bf16.msra.mxu0 %v580_v10 }
  0x3a   :  { %583 = vmatprep.subr.bf16.mxu0 %v582_v11 }
  0x3d   :  { %585 = vmatpush3.bf16.msra.mxu0 %v584_v16 }
  0x3e   :  { %587 = vmatprep.subr.bf16.mxu0 %v586_v17 }
  0x41   :  { %589 = vmatpush3.bf16.msra.mxu0 %v588_v20 }
  0x44   :  { %335 = vmatmul.mubr.f32.vlgmr.msra.gmra.mrb[2].mxu0 %v25_v21 }
  0xf7   :  { %v421_v22 = vpop.f32.mrb[0].mxu0 }
  0xf8   :  { %v422_v24 = vpop.f32.mrb[1].mxu0 }
  0xf9   :  { %v456_v25 = vpop.f32.mrb[0].mxu1  ;;  %v423_v26 = vadd.f32 %v422_v24, %v421_v22 }
  0xfa   :  { %v457_v27 = vpop.f32.mrb[1].mxu1 }
  0xfb   :  { %v458_v28 = vadd.f32 %v457_v27, %v456_v25  ;;  %v197_v29 = vadd.f32 %v423_v26, %v388_v23 }
  0xfd   :  { %v267_v30 = vadd.f32 %v458_v28, %v197_v29 }
 0x117   :  { %v491_v34 = vpop.f32.mrb[2].mxu0 }
 0x118   :  { %v492_v36 = vpop.f32.mrb[3].mxu0 }
 0x119   :  { %v493_v37 = vadd.f32 %v492_v36, %v491_v34 }
 0x11b   :  { %v337_v42 = vadd.f32 %v493_v37, %v267_v30 }
 0x11d   :  { %v346_v43 = vadd.f32 %v344_v38, %v337_v42  ;;  %v349_v44 = vadd.f32 %v347_v39, %v337_v42 }
 0x11f   :  { %v351_v46 = vrot.slane %v346_v43, 7  ;;  %v360_v47 = vrot.slane %v349_v44, 6 }
 0x121   :  { %v363_v48 = vsel %vm362_vm0, %v342_v40, %v351_v46  ;;  %371 = vst.msk [vmem:[#allocation2 + $0x8] sm:$0x3] %vm370_vm1, %v360_v47 }
 0x122   :  { %v365_v49 = vsel %vm364_vm2, %v363_v48, %v357_v45 }
 0x123   :  { %v367_v50 = vsel %vm366_vm3, %v365_v49, %v360_v47 }
 0x124   :  { %369 = vst.msk [vmem:[#allocation2] sm:$0xff] %vm368_vm4, %v367_v50 }
 0x125   :  { %604 = shalt.err (!%p601_p4)
}
 0x126   :  { %s605_s28 = scalar_lea.hbm %s982_s5, 256 }
 0x127   :  { %p606_p5 = scmp.ne.s32.totalorder %s982_s5, %s605_s28  ;;  %p609_p6 = scmp.lt.u32.totalorder %s605_s28, %s982_s5 }
 0x129   :  { %p611_p7 = pnand %p609_p6, %p606_p5 }
 0x12b   :  { %614 = shalt.err (!%p611_p7)
}
 0x12c   :  { %s618_s8 = smov 128   ;;  %s619_s9 = smov 8  }
 0x12d   :  { %383 = dma.vmem_to_hbm [thread:$0]  %s378_s4, 256, %s982_s5, [#allocation3], %s618_s8, %s618_s8, %s619_s9  }
 0x12e   :  { %615 = dma.done.wait [#allocation3], 256  }
 0x12f   :  { %616 = vsyncadd [#allocation3], 4294967040 }
 0x130   :  { %387 = vsyncpa [#allocation3], 1 }

</bundles_post_ra>
